<compile_context>
chip_gen: v6e
topology: v6e:2x2x1
jax: 0.10.0
libtpu: 0.0.40
codegen_flags: <defaults>
</compile_context>

<pallas_src>
import jax
import jax.numpy as jnp
from jax.experimental import pallas as pl
from jax.experimental.pallas import tpu as pltpu


def linear_kernel(x_ref, w_ref, b_ref, o_ref):
    # x_ref: (TM, ndim) VMEM; w_ref: (1, ndim) VMEM (grid-resident);
    # b_ref: (1,) SMEM scalar; o_ref: (1, TM) VMEM, lane-dense.
    #
    # VPU elementwise multiply in the input dtype (bf16 VALU exists on v6e/v7x;
    # Mosaic upcasts internally on v5e), then XLU lane-reduce with f32 accum.
    prod = x_ref[...] * w_ref[...]                        # (TM, ndim)
    acc = jnp.sum(prod, axis=-1, dtype=jnp.float32)       # (TM,) f32
    # Column -> lane-dense row relayout rides the otherwise-idle XLU slot.
    o_ref[...] = (acc + b_ref[0]).reshape(1, -1).astype(o_ref.dtype)


def _round_up(v, m):
    return ((v + m - 1) // m) * m


def _vmem_plan():
    """Per-TPU-generation (target x bytes per buffer, vmem_limit_bytes or None)."""
    try:
        kind = jax.devices()[0].device_kind.lower()
    except Exception:
        kind = ""
    if "v6" in kind or "v7" in kind:
        # Faster HBM -> larger tiles to amortize per-step overhead; the total
        # stays within the 32 MiB scoped default (set explicitly for clarity).
        return 6 * 1024 * 1024, 32 * 1024 * 1024
    # v5e (16 MiB scoped default) and unknown chips: stay conservative.
    return 2 * 1024 * 1024, None


def _pick_tm(batch, ndim, itemsize, sublane, target_x_bytes,
             vmem_budget_bytes=14 * 1024 * 1024):
    """Pick the batch-tile size using PHYSICAL VMEM bytes.

    One x buffer really holds tm * round_up(ndim, 128) * itemsize bytes (lanes
    pad to 128); the x stream is double-buffered (x2); the resident (1, ndim)
    weight pads to 8 sublanes (x2 buffers); the lane-dense (1, tm) output adds
    ~2 * tm * itemsize.  The total stays under `vmem_budget_bytes` so the
    kernel compiles inside every generation's scoped-VMEM default.
    """
    ndim_phys = _round_up(ndim, 128)
    x_row = ndim_phys * itemsize                  # physical bytes per x row per buffer
    weight_bytes = 2 * 8 * x_row                  # (1, ndim) pads to 8 sublanes, x2 buffers
    out_per_row = 2 * max(itemsize, 4)            # double-buffered lane-dense output

    rows = target_x_bytes // x_row
    rows = min(rows, max(sublane,
                         (vmem_budget_bytes - weight_bytes) // (2 * x_row + out_per_row)))
    rows = max(rows, sublane)

    if rows >= batch:
        tm = _round_up(batch, sublane)            # single tile: block == full out dim is legal
        if batch >= 256:
            # Give a 2-TensorCore chip (v7x) >= 2 parallel grid steps while
            # keeping output blocks lane-aligned (multiple of 128).
            tm = min(tm, _round_up(pl.cdiv(batch, 2), 128))
        return tm
    # Multiple tiles: keep tm a multiple of 128 so output blocks / offsets stay
    # lane-aligned (unmasked vst stores).
    return max(128, (rows // 128) * 128)


def linear_model(x, weight, bias):
    """Pallas equivalent of LinearModel.forward: x.mm(weight) + bias."""
    batch, ndim = x.shape
    assert weight.shape == (ndim, 1)

    w_row = weight.reshape(1, ndim)                   # lane-dense weight for the VPU reduce
    bias_f32 = bias.reshape(1).astype(jnp.float32)    # scalar bias -> 32-bit SMEM slot

    itemsize = x.dtype.itemsize
    sublane = max(8, 32 // itemsize)                  # 8 f32 / 16 bf16 / 32 int8-fp8
    target_x_bytes, vmem_limit = _vmem_plan()
    tm = _pick_tm(batch, ndim, itemsize, sublane, target_x_bytes)
    num_tiles = pl.cdiv(batch, tm)
    padded = num_tiles * tm

    cost = pl.CostEstimate(
        flops=2 * batch * ndim,
        transcendentals=0,
        bytes_accessed=(batch * ndim + ndim) * itemsize + padded * itemsize + 4,
    )

    out_row = pl.pallas_call(
        linear_kernel,
        out_shape=jax.ShapeDtypeStruct((1, padded), x.dtype),
        grid_spec=pltpu.PrefetchScalarGridSpec(
            num_scalar_prefetch=0,
            grid=(num_tiles,),
            in_specs=[
                # x streams through VMEM, one batch tile per grid step
                # (double-buffered; a partial last tile is handled by masking).
                pl.BlockSpec((tm, ndim), lambda i: (i, 0)),
                # weight is tiny and constant across the grid -> VMEM resident.
                pl.BlockSpec((1, ndim), lambda i: (0, 0)),
                # scalar bias on the scalar path (no VMEM tile / DMA).
                pl.BlockSpec(memory_space=pltpu.MemorySpace.SMEM),
            ],
            # Lane-dense output row: unmasked stores, ~16x less out VMEM than (tm, 1).
            out_specs=pl.BlockSpec((1, tm), lambda i: (0, i)),
        ),
        compiler_params=pltpu.CompilerParams(
            # Independent batch tiles: lets v7x shard across its 2 TensorCores.
            dimension_semantics=("parallel",),
            vmem_limit_bytes=vmem_limit,
        ),
        cost_estimate=cost,
    )(x, w_row, bias_f32)

    # Back to the module's (batch, 1) layout; drop the batch padding.
    return out_row[0, :batch].reshape(batch, 1)


if __name__ == "__main__":
    # Small shapes consistent with the module: batch=8, ndim=32.
    batch, ndim = 8, 32
    key = jax.random.PRNGKey(0)
    kx, kw, kb = jax.random.split(key, 3)

    x = jax.random.normal(kx, (batch, ndim), dtype=jnp.float32)
    weight = jax.random.normal(kw, (ndim, 1), dtype=jnp.float32)   # ~ torch.randn(ndim, 1)
    bias = jax.random.normal(kb, (1,), dtype=jnp.float32)          # ~ torch.randn(1)

    out = jax.block_until_ready(linear_model(x, weight, bias))
    ref = x @ weight + bias
    assert out.shape == (batch, 1)
    assert jnp.allclose(out, ref, atol=1e-5, rtol=1e-5), (out, ref)

    # Ragged sanity check: batch not a multiple of the sublane tile and
    # ndim % 128 != 0 (exercises the masked partial x tile + padded-out slice).
    b2, d2 = 13, 200
    k1, k2 = jax.random.split(kx)
    x2 = jax.random.normal(k1, (b2, d2), dtype=jnp.float32)
    w2 = jax.random.normal(k2, (d2, 1), dtype=jnp.float32)
    out2 = jax.block_until_ready(linear_model(x2, w2, bias))
    assert out2.shape == (b2, 1)
    assert jnp.allclose(out2, x2 @ w2 + bias, atol=1e-4, rtol=1e-4)

    print("KERNEL_OK")
</pallas_src>

<mosaic_0001>
module attributes {stable_mosaic.version = 11 : i64} {
  func.func @linear_kernel(%arg0: i32, %arg1: memref<8x32xf32, #tpu.memory_space<vmem>>, %arg2: memref<1x32xf32, #tpu.memory_space<vmem>>, %arg3: memref<1xf32, #tpu.memory_space<smem>>, %arg4: memref<1x8xf32, #tpu.memory_space<vmem>>) attributes {dimension_semantics = [#tpu.dimension_semantics<parallel>], iteration_bounds = array<i64: 1>, scalar_prefetch = 0 : i64, scratch_operands = 0 : i64, tpu.core_type = #tpu.core_type<tc>, window_params = [{transform_indices = @transform_0, window_bounds = array<i64: 8, 32>}, {pipeline_mode = #tpu.pipeline_mode<synchronous>, transform_indices = @transform_1, window_bounds = array<i64: 1, 32>}, {transform_indices = @transform_2, window_bounds = array<i64: 1>}, {transform_indices = @transform_3, window_bounds = array<i64: 1, 8>}]} {
    %c0 = arith.constant 0 : index
    %c0_0 = arith.constant 0 : index
    %0 = vector.load %arg1[%c0, %c0_0] : memref<8x32xf32, #tpu.memory_space<vmem>>, vector<8x32xf32>
    %c0_1 = arith.constant 0 : index
    %c0_2 = arith.constant 0 : index
    %1 = vector.load %arg2[%c0_1, %c0_2] : memref<1x32xf32, #tpu.memory_space<vmem>>, vector<1x32xf32>
    %2 = vector.broadcast %1 : vector<1x32xf32> to vector<8x32xf32>
    %3 = arith.mulf %0, %2 : vector<8x32xf32>
    %cst = arith.constant dense<0.000000e+00> : vector<8xf32>
    %4 = vector.multi_reduction <add>, %3, %cst [1] : vector<8x32xf32> to vector<8xf32>
    %c0_3 = arith.constant 0 : index
    %5 = memref.load %arg3[%c0_3] : memref<1xf32, #tpu.memory_space<smem>>
    %6 = vector.broadcast %5 : f32 to vector<8xf32>
    %7 = arith.addf %4, %6 : vector<8xf32>
    %8 = vector.shape_cast %7 : vector<8xf32> to vector<1x8xf32>
    %c0_4 = arith.constant 0 : index
    %c0_5 = arith.constant 0 : index
    %9 = vector.load %arg4[%c0_4, %c0_5] : memref<1x8xf32, #tpu.memory_space<vmem>>, vector<1x8xf32>
    tpu.vector_store %arg4[%c0_4, %c0_5], %8 {strides = array<i32>} : memref<1x8xf32, #tpu.memory_space<vmem>>, vector<1x8xf32>,
    return
  }
  func.func @transform_0(%arg0: i32) -> (i32, i32) {
    %c0_i32 = arith.constant 0 : i32
    %c0_i32_0 = arith.constant 0 : i32
    return %arg0, %c0_i32 : i32, i32
  }
  func.func @transform_1(%arg0: i32) -> (i32, i32) {
    %c0_i32 = arith.constant 0 : i32
    %c0_i32_0 = arith.constant 0 : i32
    %c0_i32_1 = arith.constant 0 : i32
    return %c0_i32, %c0_i32_0 : i32, i32
  }
  func.func @transform_2(%arg0: i32) -> i32 {
    %c0_i32 = arith.constant 0 : i32
    %c0_i32_0 = arith.constant 0 : i32
    return %c0_i32 : i32
  }
  func.func @transform_3(%arg0: i32) -> (i32, i32) {
    %c0_i32 = arith.constant 0 : i32
    %c0_i32_0 = arith.constant 0 : i32
    return %c0_i32, %arg0 : i32, i32
  }
}

</mosaic_0001>

<bundles_post_ra>
// kernel: tpu_custom_call.1
= control target key start
LH: loop header
LB: loop body
LE: loop exit
PB: predicated region body
PF: predicated region fallthrough
CT: control target
= control target key end

     0   :  { %9 = vsyncpa [#allocation4], 0  ;;  %s150_s0 = inlined_call_operand.hbm [shape: f32[8,32], index: 0, kind: input, shape index: {}]   ;;  %s151_s1 = inlined_call_operand.vmem [shape: f32[1,32], index: 1, kind: input, shape index: {}]   ;;  %s152_s2 = inlined_call_operand.<no memory space> [shape: f32[1], index: 2, kind: input, shape index: {}]   ;;  %s153_s3 = inlined_call_operand.hbm [shape: f32[1,8], index: 3, kind: output, shape index: {}]  }
   0x1   :  { %10 = vsyncpa [#allocation5], 0  ;;  %s116_s12 = smov [#allocation3]  }
   0x2   :  { %s17_s13 = sshll.u32 %s116_s12, 4  ;;  %s18_s13 = int_to_ptr.vmem [resolvable:$true] %s17_s13 }
   0x3   :  { %s80_s14 = scalar_lea.vmem %s18_s13, 128  ;;  %p85_p1 = scmp.lt.s32.totalorder %s18_s13, %s18_s13 }
   0x4   :  { %p81_p0 = scmp.ne.s32.totalorder %s18_s13, %s80_s14  ;;  %p86_p2 = scmp.lt.s32.totalorder %s80_s14, %s80_s14 }
   0x6   :  { %p87_p3 = por %p86_p2, %p85_p1 }
   0x8   :  { %p88_p4 = pnand %p87_p3, %p81_p0 }
   0xa   :  { %91 = shalt.err (!%p88_p4)
}
   0xb   :  { %20 = dma.hbm_to_vmem [thread:$0]  %s150_s0, 128, %s18_s13, [#allocation4]  }
   0xc   :  { %112 = dma.done.wait [#allocation4], 128  }
   0xd   :  { %113 = vsyncadd [#allocation4], 4294967168  ;;  %v28_v0 = vld [vmem:[#allocation3] sm:$0xff]  ;;  %vm37_vm0 = vcmask 261120   ;;  %v45_v4 = vlaneseq  ;;  %v42_v7 = vstv %s152_s2  ;;  %s117_s0 = smov [#allocation6]   ;;  %vm52_vm1 = vcmask 57344  }
   0xe   :  { %v69_v1 = vld [vmem:[%s151_s1] ss:$0 sm:$0xff]  ;;  %s60_s21 = sshll.u32 %s117_s0, 4  ;;  %s61_s21 = int_to_ptr.vmem [resolvable:$true] %s60_s21 }
   0xf   :  { %v36_v2 = vmul.f32 %v69_v1, %v28_v0  ;;  %v46_v5 = vand.u32 127, %v45_v4  ;;  %v48_v6 = vshrl.u32 %v45_v4, 7  ;;  %s92_s1 = scalar_lea.vmem %s61_s21, 16  ;;  %s96_s22 = scalar_lea.vmem %s61_s21, 32 }
  0x10   :  { %p93_p5 = scmp.ne.s32.totalorder %s61_s21, %s92_s1  ;;  %p97_p6 = scmp.lt.s32.totalorder %s61_s21, %s61_s21 }
  0x11   :  { %v38_v3 = vsel %vm37_vm0, %v36_v2, 0.0  ;;  %v49_v8 = vsub.s32 %v46_v5, %v48_v6  ;;  %p98_p7 = scmp.lt.s32.totalorder %s96_s22, %s92_s1 }
  0x12   :  { %39 = vadd.xlane.f32.xlu0 %v38_v3 }
  0x13   :  { %p99_p8 = por %p98_p7, %p97_p6 }
  0x15   :  { %p100_p9 = pnand %p99_p8, %p93_p5 }
  0x9b   :  { %v40_v9 = vpop.xlane.xlu0 %39 }
  0x9c   :  { %v43_v10 = vadd.f32 %v42_v7, %v40_v9 }
  0x9e   :  { %v50_v11 = vrot.slane %v43_v10, %v49_v8 }
  0xa0   :  { %53 = vst.msk [vmem:[#allocation6] sm:$0x1] %vm52_vm1, %v50_v11 }
  0xa1   :  { %103 = shalt.err (!%p100_p9)
}
  0xa2   :  { %63 = dma.vmem_to_hbm [thread:$0]  %s61_s21, 16, %s153_s3, [#allocation5]  }
  0xa3   :  { %114 = dma.done.wait [#allocation5], 16  }
  0xa4   :  { %115 = vsyncadd [#allocation5], 4294967280 }
  0xa5   :  { %67 = vsyncpa [#allocation4], 1 }
  0xa6   :  { %68 = vsyncpa [#allocation5], 1 }

</bundles_post_ra>
